<compile_context>
chip_gen: v7x
topology: tpu7x:2x2x1
jax: 0.10.0
libtpu: 0.0.40
codegen_flags: <defaults>
</compile_context>

<pallas_src>
import functools

import jax
import jax.numpy as jnp
from jax.experimental import pallas as pl
from jax.experimental.pallas import tpu as pltpu

VMEM_SPEC = pl.BlockSpec(memory_space=pltpu.MemorySpace.VMEM)

EXPANSION = 4
BASE = 8                      # real ResNet-50 uses 64
LAYERS = [3, 4, 6, 3]         # ResNet-50 bottleneck counts
PLANES = [BASE, BASE * 2, BASE * 4, BASE * 8]
BN_EPS = 1e-5

LANE = 128                    # TPU lane width; pad channel dims to this
TM_MAX = 256                  # M-tile (rows) per grid step; sized for v7x 64 MiB VMEM
VMEM_LIMIT = 48 * 1024 * 1024


def cpad(c):
    """Pad a channel count up to a multiple of 128 (lane-dense stores)."""
    return max(LANE, ((c + LANE - 1) // LANE) * LANE)


# ----------------------------------------------------------------------------
# Pallas kernels
# ----------------------------------------------------------------------------
def _conv_matmul_kernel(x_ref, w_ref, b_ref, *rest, relu, residual):
    """(TM, K)bf16 @ (K, Cout)bf16 on the MXU, f32 accumulate, fused epilogue:
    +bias [+identity] [ReLU], stored as bf16."""
    if residual:
        id_ref, o_ref = rest
    else:
        (o_ref,) = rest
    acc = jnp.dot(x_ref[...], w_ref[...], preferred_element_type=jnp.float32)
    y = acc + b_ref[...]                       # (1, Cout) f32 broadcast
    if residual:
        y = y + id_ref[...].astype(jnp.float32)
    if relu:
        y = jnp.maximum(y, 0.0)
    o_ref[...] = y.astype(o_ref.dtype)


def _max_reduce_kernel(x_ref, o_ref):
    # x: (TM, 9, C) -> max over the tap (sublane) axis; C stays on lanes.
    o_ref[...] = jnp.max(x_ref[...].astype(jnp.float32), axis=1).astype(o_ref.dtype)


def _avgpool_kernel(x_ref, o_ref):
    # x: (N, H*W, C) -> mean over spatial, accumulated in f32.
    o_ref[...] = jnp.mean(x_ref[...].astype(jnp.float32), axis=1)


# ----------------------------------------------------------------------------
# JIT-cached Pallas wrappers
# ----------------------------------------------------------------------------
@functools.partial(jax.jit, static_argnames=("relu",))
def matmul_bias(x, w, bias, identity, *, relu):
    """Gridded (over M) conv-as-matmul with fused bias / residual / ReLU."""
    m, k = x.shape
    _, cout = w.shape
    residual = identity is not None

    tm = m if m <= TM_MAX else TM_MAX          # full-dim block when small
    grid = (pl.cdiv(m, tm),)

    in_specs = [
        pl.BlockSpec((tm, k), lambda i: (i, 0)),        # streamed rows
        pl.BlockSpec((k, cout), lambda i: (0, 0)),      # weights, VMEM-resident
        pl.BlockSpec((1, cout), lambda i: (0, 0)),      # bias, VMEM-resident
    ]
    operands = [x, w, bias.reshape(1, cout)]
    bytes_accessed = 2 * (m * k + k * cout + m * cout) + 4 * cout
    if residual:
        in_specs.append(pl.BlockSpec((tm, cout), lambda i: (i, 0)))
        operands.append(identity)
        bytes_accessed += 2 * m * cout

    kern = functools.partial(_conv_matmul_kernel, relu=relu, residual=residual)
    return pl.pallas_call(
        kern,
        grid=grid,
        out_shape=jax.ShapeDtypeStruct((m, cout), jnp.bfloat16),
        in_specs=in_specs,
        out_specs=pl.BlockSpec((tm, cout), lambda i: (i, 0)),
        compiler_params=pltpu.CompilerParams(
            dimension_semantics=("parallel",),
            vmem_limit_bytes=VMEM_LIMIT),
        cost_estimate=pl.CostEstimate(
            flops=2 * m * k * cout,
            transcendentals=0,
            bytes_accessed=bytes_accessed),
    )(*operands)


@jax.jit
def max_reduce(cols):
    """cols: (M, 9, C) -> (M, C) max over the tap axis, gridded over M."""
    m, taps, c = cols.shape
    tm = m if m <= TM_MAX else TM_MAX
    grid = (pl.cdiv(m, tm),)
    return pl.pallas_call(
        _max_reduce_kernel,
        grid=grid,
        out_shape=jax.ShapeDtypeStruct((m, c), cols.dtype),
        in_specs=[pl.BlockSpec((tm, taps, c), lambda i: (i, 0, 0))],
        out_specs=pl.BlockSpec((tm, c), lambda i: (i, 0)),
        compiler_params=pltpu.CompilerParams(
            dimension_semantics=("parallel",),
            vmem_limit_bytes=VMEM_LIMIT),
    )(cols)


@jax.jit
def global_avgpool(x_flat):
    n, _, c = x_flat.shape
    return pl.pallas_call(
        _avgpool_kernel,
        out_shape=jax.ShapeDtypeStruct((n, c), jnp.float32),
        in_specs=[VMEM_SPEC],
        out_specs=VMEM_SPEC,
    )(x_flat)


# ----------------------------------------------------------------------------
# Glue: patch extraction (im2col) in plain JAX
# ----------------------------------------------------------------------------
def extract_patches(x, kh, kw, stride, pad, pad_value=0.0):
    """x: (N, H, W, C) -> patches (N, OH, OW, kh*kw, C)."""
    n, h, w, c = x.shape
    xp = jnp.pad(x, ((0, 0), (pad, pad), (pad, pad), (0, 0)),
                 constant_values=pad_value)
    oh = (h + 2 * pad - kh) // stride + 1
    ow = (w + 2 * pad - kw) // stride + 1
    pieces = []
    for i in range(kh):
        for j in range(kw):
            sl = jax.lax.slice(
                xp,
                (0, i, j, 0),
                (n, i + (oh - 1) * stride + 1, j + (ow - 1) * stride + 1, c),
                (1, stride, stride, 1))
            pieces.append(sl)
    cols = jnp.stack(pieces, axis=3)  # (N, OH, OW, kh*kw, C)
    return cols, oh, ow


def conv_bn(x, p, *, stride, pad, relu, identity=None):
    """Conv (1x1 direct / kxk via im2col) + folded BN + optional residual + ReLU."""
    kh, kw, cin, cout = p["w"].shape
    n = x.shape[0]
    if kh == 1 and kw == 1 and pad == 0:
        # 1x1 conv: pure per-pixel matmul, no im2col.
        if stride > 1:
            x = x[:, ::stride, ::stride, :]
        n, oh, ow, _ = x.shape
        cols = x.reshape(n * oh * ow, cin)
    else:
        cols, oh, ow = extract_patches(x, kh, kw, stride, pad)
        cols = cols.reshape(n * oh * ow, kh * kw * cin)
    w2 = p["w"].reshape(kh * kw * cin, cout)
    idf = None if identity is None else identity.reshape(n * oh * ow, cout)
    y = matmul_bias(cols, w2, p["bias"], idf, relu=relu)
    return y.reshape(n, oh, ow, cout)


def maxpool_3x3_s2(x):
    n, _, _, c = x.shape
    cols, oh, ow = extract_patches(x, 3, 3, 2, 1, pad_value=-jnp.inf)
    cols = cols.reshape(n * oh * ow, 9, c)   # no transpose: C stays on lanes
    y = max_reduce(cols)
    return y.reshape(n, oh, ow, c)


# ----------------------------------------------------------------------------
# Parameters (deterministic synthetic init; BN scale folded into weights,
# channel dims zero-padded to multiples of 128)
# ----------------------------------------------------------------------------
def init_conv_bn(key, kh, kw, cin, cout, cin_p=None, cout_p=None):
    cin_p = cpad(cin) if cin_p is None else cin_p
    cout_p = cpad(cout) if cout_p is None else cout_p
    kw_, kg, kb, km, kv = jax.random.split(key, 5)
    fan_in = kh * kw * cin
    w = jax.random.normal(kw_, (kh, kw, cin, cout), jnp.float32) * jnp.sqrt(2.0 / fan_in)
    gamma = 1.0 + 0.1 * jax.random.normal(kg, (cout,), jnp.float32)
    beta = 0.1 * jax.random.normal(kb, (cout,), jnp.float32)
    mean = 0.1 * jax.random.normal(km, (cout,), jnp.float32)
    var = jax.random.uniform(kv, (cout,), jnp.float32, minval=0.5, maxval=1.5)
    scale = gamma / jnp.sqrt(var + BN_EPS)
    bias = beta - mean * scale
    w = w * scale[None, None, None, :]          # fold BN scale into the weights
    w = jnp.pad(w, ((0, 0), (0, 0), (0, cin_p - cin), (0, cout_p - cout)))
    bias = jnp.pad(bias, (0, cout_p - cout))    # padded channels stay exactly 0
    return {"w": w.astype(jnp.bfloat16), "bias": bias.astype(jnp.float32)}


def init_bottleneck(key, inplanes, planes, stride):
    keys = jax.random.split(key, 4)
    p = {
        "conv1": init_conv_bn(keys[0], 1, 1, inplanes, planes),
        "conv2": init_conv_bn(keys[1], 3, 3, planes, planes),
        "conv3": init_conv_bn(keys[2], 1, 1, planes, planes * EXPANSION),
        "stride": stride,
    }
    if stride != 1 or inplanes != planes * EXPANSION:
        p["downsample"] = init_conv_bn(keys[3], 1, 1, inplanes, planes * EXPANSION)
    return p


def init_params(key):
    keys = jax.random.split(key, 1 + sum(LAYERS))
    params = {"conv1": init_conv_bn(keys[0], 7, 7, 3, BASE, cin_p=3), "layers": []}
    inplanes = BASE
    ki = 1
    for li, (nblocks, planes) in enumerate(zip(LAYERS, PLANES)):
        layer_stride = 1 if li == 0 else 2
        layer = []
        for bi in range(nblocks):
            s = layer_stride if bi == 0 else 1
            layer.append(init_bottleneck(keys[ki], inplanes, planes, s))
            ki += 1
            inplanes = planes * EXPANSION
        params["layers"].append(layer)
    return params


# ----------------------------------------------------------------------------
# Forward pass (mirrors ft_net.forward)
# ----------------------------------------------------------------------------
def bottleneck_forward(x, p):
    out = conv_bn(x, p["conv1"], stride=1, pad=0, relu=True)
    out = conv_bn(out, p["conv2"], stride=p["stride"], pad=1, relu=True)
    if "downsample" in p:
        identity = conv_bn(x, p["downsample"], stride=p["stride"], pad=0, relu=False)
    else:
        identity = x
    # conv3 + BN + residual add + ReLU fused into a single kernel epilogue.
    out = conv_bn(out, p["conv3"], stride=1, pad=0, relu=True, identity=identity)
    return out


def ft_net_forward(params, x_nchw, mode="fc_feature"):
    """x_nchw: (N, 3, H, W) float32.  Returns (N, C) for 'fc_feature',
    (N, C, 1, 1) for 'cnn_vis' (matching torch's unflattened avgpool output)."""
    # TODO(synk): the matplotlib feature-map dumps (draw_features / plt.plot) in
    # 'cnn_vis' mode are visualization I/O with no Pallas equivalent; only the
    # tensor compute is reproduced.
    x = jnp.transpose(x_nchw, (0, 2, 3, 1)).astype(jnp.bfloat16)  # NCHW -> NHWC bf16
    x = conv_bn(x, params["conv1"], stride=2, pad=3, relu=True)   # conv1+bn1+relu
    x = maxpool_3x3_s2(x)                                         # maxpool
    for layer in params["layers"]:                                # layer1..layer4
        for blk in layer:
            x = bottleneck_forward(x, blk)
    n, h, w, c = x.shape
    feat = global_avgpool(x.reshape(n, h * w, c))                 # avgpool (f32)
    feat = feat[:, :PLANES[-1] * EXPANSION]                       # drop lane padding
    if mode == "cnn_vis":
        return feat.reshape(n, PLANES[-1] * EXPANSION, 1, 1)
    return feat                                                   # x.view(N, -1)


# ----------------------------------------------------------------------------
if __name__ == "__main__":
    key = jax.random.PRNGKey(0)
    kparam, kdata = jax.random.split(key)
    params = init_params(kparam)
    x = jax.random.normal(kdata, (2, 3, 32, 32), jnp.float32)   # small NCHW input

    feat = ft_net_forward(params, x, mode="fc_feature")
    feat = jax.block_until_ready(feat)
    assert feat.shape == (2, BASE * 8 * EXPANSION), feat.shape  # (2, 256)
    assert bool(jnp.all(jnp.isfinite(feat)))
    print("KERNEL_OK")
</pallas_src>

<mosaic_0001>
module attributes {stable_mosaic.version = 11 : i64} {
  func.func @_conv_matmul_kernel(%arg0: i32, %arg1: memref<256x147xbf16, #tpu.memory_space<vmem>>, %arg2: memref<147x128xbf16, #tpu.memory_space<vmem>>, %arg3: memref<1x128xf32, #tpu.memory_space<vmem>>, %arg4: memref<256x128xbf16, #tpu.memory_space<vmem>>) attributes {dimension_semantics = [#tpu.dimension_semantics<parallel>], iteration_bounds = array<i64: 2>, scalar_prefetch = 0 : i64, scratch_operands = 0 : i64, tpu.core_type = #tpu.core_type<tc>, window_params = [{transform_indices = @transform_0, window_bounds = array<i64: 256, 147>}, {pipeline_mode = #tpu.pipeline_mode<synchronous>, transform_indices = @transform_1, window_bounds = array<i64: 147, 128>}, {pipeline_mode = #tpu.pipeline_mode<synchronous>, transform_indices = @transform_2, window_bounds = array<i64: 1, 128>}, {transform_indices = @transform_3, window_bounds = array<i64: 256, 128>}]} {
    %c0 = arith.constant 0 : index
    %c0_0 = arith.constant 0 : index
    %0 = vector.load %arg1[%c0, %c0_0] : memref<256x147xbf16, #tpu.memory_space<vmem>>, vector<256x147xbf16>
    %c0_1 = arith.constant 0 : index
    %c0_2 = arith.constant 0 : index
    %1 = vector.load %arg2[%c0_1, %c0_2] : memref<147x128xbf16, #tpu.memory_space<vmem>>, vector<147x128xbf16>
    %cst = arith.constant dense<0.000000e+00> : vector<256x128xf32>
    %2 = tpu.matmul %0, %1, %cst {dimension_numbers = #tpu.dot_dimension_numbers<[1], [0], [0], [1], [0, 0, 1, 1], [], []>} : vector<256x147xbf16>, vector<147x128xbf16>, vector<256x128xf32> -> vector<256x128xf32>
    %c0_3 = arith.constant 0 : index
    %c0_4 = arith.constant 0 : index
    %3 = vector.load %arg3[%c0_3, %c0_4] : memref<1x128xf32, #tpu.memory_space<vmem>>, vector<1x128xf32>
    %4 = vector.broadcast %3 : vector<1x128xf32> to vector<256x128xf32>
    %5 = arith.addf %2, %4 : vector<256x128xf32>
    %cst_5 = arith.constant 0.000000e+00 : f32
    %6 = vector.broadcast %cst_5 : f32 to vector<256x128xf32>
    %7 = arith.maximumf %5, %6 : vector<256x128xf32>
    %8 = arith.truncf %7 : vector<256x128xf32> to vector<256x128xbf16>
    %c0_6 = arith.constant 0 : index
    %c0_7 = arith.constant 0 : index
    %9 = vector.load %arg4[%c0_6, %c0_7] : memref<256x128xbf16, #tpu.memory_space<vmem>>, vector<256x128xbf16>
    tpu.vector_store %arg4[%c0_6, %c0_7], %8 {strides = array<i32>} : memref<256x128xbf16, #tpu.memory_space<vmem>>, vector<256x128xbf16>,
    return
  }
  func.func @transform_0(%arg0: i32) -> (i32, i32) {
    %c0_i32 = arith.constant 0 : i32
    %c0_i32_0 = arith.constant 0 : i32
    return %arg0, %c0_i32 : i32, i32
  }
  func.func @transform_1(%arg0: i32) -> (i32, i32) {
    %c0_i32 = arith.constant 0 : i32
    %c0_i32_0 = arith.constant 0 : i32
    %c0_i32_1 = arith.constant 0 : i32
    return %c0_i32, %c0_i32_0 : i32, i32
  }
  func.func @transform_2(%arg0: i32) -> (i32, i32) {
    %c0_i32 = arith.constant 0 : i32
    %c0_i32_0 = arith.constant 0 : i32
    %c0_i32_1 = arith.constant 0 : i32
    return %c0_i32, %c0_i32_0 : i32, i32
  }
  func.func @transform_3(%arg0: i32) -> (i32, i32) {
    %c0_i32 = arith.constant 0 : i32
    %c0_i32_0 = arith.constant 0 : i32
    return %arg0, %c0_i32 : i32, i32
  }
}

</mosaic_0001>

<bundles_post_ra>
// kernel: matmul_bias.1
= control target key start
LH: loop header
LB: loop body
LE: loop exit
PB: predicated region body
PF: predicated region fallthrough
CT: control target
= control target key end

     0   :  { %8 = vsyncpa [#allocation3], 0  ;;  %s1605_s0 = inlined_call_operand.vmem [shape: bf16[512,147], index: 0, kind: input, shape index: {}]   ;;  %s1606_s1 = inlined_call_operand.vmem [shape: bf16[147,128], index: 1, kind: input, shape index: {}]   ;;  %s1607_s2 = inlined_call_operand.vmem [shape: f32[1,128], index: 2, kind: input, shape index: {}]   ;;  %s1608_s3 = inlined_call_operand.hbm [shape: bf16[512,128], index: 3, kind: output, shape index: {}]  }
   0x1   :  { %10 = vsyncpa [#allocation3 + $0x1], 0  ;;  %s1363_s12 = smov 0   ;;  %s1365_s13 = smov 0  }
   0x2   :  { %s1367_s14 = smov 0   ;;  %s1369_s15 = smov 0  }
   0x3 LB: > { %s1384_s16 = sadd.s32 4294967295, %s1336_s15   ;;  %s920_s17 = sadd.s32 4294967294, %s1336_s15   ;;  %s1336_s15 = sphi %s1369_s15, %s1614_s15   ;;  %s1332_s14 = sphi %s1367_s14, %s1613_s14   ;;  %s1328_s13 = sphi %s1365_s13, %s1612_s13   ;;  %s1324_s12 = sphi %s1363_s12, %s1611_s12  }
   0x4   : > { %s1388_s18 = sadd.s32 1, %s1336_s15   ;;  %s91_s19 = sadd.s32 1, %s1332_s14 }
   0x5   : > { %s88_s20 = ssub.s32 %s1336_s15, %s1388_s18  ;;  %p101_p0 = scmp.ne.s32.totalorder %s1332_s14, %s1328_s13 }
   0x6   : > { %p89_p1 = scmp.eq.s32.totalorder %s88_s20, 0  ;;  %p102_p2 = scmp.eq.s32.totalorder %s1384_s16, 1 }
   0x7   : > { %p107_p3 = scmp.ne.s32.totalorder %s1328_s13, %s1324_s12  ;;  %p108_p4 = scmp.eq.s32.totalorder %s920_s17, 1 }
   0x8   : > { %s1399_s21 = scalar_select %p89_p1, %s1332_s14, %s91_s19  }
   0x9   : > { %p1401_p5 = por %p102_p2, %p101_p0  ;;  %p1405_p6 = por %p108_p4, %p107_p3 }
   0xa   : > { %p923_p7 = scmp.ge.s32.totalorder %s1336_s15, 1  ;;  %p142_p8 = scmp.lt.s32.totalorder %s1336_s15, 3 }
   0xc   : > { %p143_p9 = pnand %p923_p7, %p142_p8 }
   0xd   : > { %v1216_v0 = vld [vmem:[%s1606_s1] sm:$0xff] (!%p143_p9)   ;;  %v1338_v1 = vmov (!%p143_p9), 0   ;;  %v1217_v2 = vld [vmem:[%s1606_s1 + $0x8] sm:$0xff] (!%p143_p9)   ;;  %v1218_v3 = vld [vmem:[%s1606_s1 + $0x10] sm:$0xff] (!%p143_p9)   ;;  %s925_s30 = sshll.u32 (!%p143_p9), %s1384_s16, 5  ;;  %vm435_vm0 = vcmask (!%p143_p9), 154624  }
   0xe   : > { %146 = sbr.rel (%p143_p9) target bundleno = 345 (0x159), region = 32  ;;  %491 = vmatprep.subr.bf16.mxu0 (!%p143_p9), %v1338_v1  ;;  %1153 = vmatprep.subr.bf16.mxu1 (!%p143_p9), %v1338_v1  ;;  %p168_p10 = scmp.lt.s32.totalorder (!%p143_p9), %s925_s30, 63  ;;  %v1219_v4 = vld [vmem:[%s1606_s1 + $0x18] sm:$0xff] (!%p143_p9)   ;;  %v1220_v5 = vld [vmem:[%s1606_s1 + $0x20] sm:$0xff] (!%p143_p9)   ;;  %v1221_v8 = vld [vmem:[%s1606_s1 + $0x28] sm:$0xff] (!%p143_p9)   ;;  %vm484_vm1 = vcmask (!%p143_p9), 1040384  }
   0xf   : > { %492 = vmatpush1.bf16.msra.mxu0 (!%p143_p9), %v1216_v0  ;;  %1163 = vmatpush1.bf16.msra.mxu1 (!%p143_p9), %v1216_v0  ;;  %v1222_v9 = vld [vmem:[%s1606_s1 + $0x30] sm:$0xff] (!%p143_p9)   ;;  %v1223_v10 = vld [vmem:[%s1606_s1 + $0x38] sm:$0xff] (!%p143_p9)   ;;  %vm485_vm2 = vcmask (!%p143_p9), 1041408   ;;  %v1339_v11 = vmov (!%p143_p9), 65535   ;;  %v1224_v13 = vld [vmem:[%s1606_s1 + $0x40] sm:$0xff] (!%p143_p9)   ;;  %s1340_s24 = smov (!%p143_p9), [#allocation2]  }
  0x10   : > { %493 = vmatprep.subr.bf16.mxu0 (!%p143_p9), %v1338_v1  ;;  %1154 = vmatprep.subr.bf16.mxu1 (!%p143_p9), %v1338_v1  ;;  %v486_v12 = vsel (!%p143_p9), %vm484_vm1, 4294967295, %v1339_v11  ;;  %v1225_v14 = vld [vmem:[%s1606_s1 + $0x48] ss:$0 sps:$4 sm:$0x33] (!%p143_p9)   ;;  %v1498_v47 = vld [vmem:[%s1607_s2] ss:$0 sm:$0xff] (!%p143_p9) }
  0x11   : > { %v487_v15 = vsel (!%p143_p9), %vm485_vm2, %v486_v12, 0  ;;  %s1278_s25 = sshll.u32 (!%p143_p9), %s1340_s24, 4  ;;  %s1279_s25 = int_to_ptr.vmem [resolvable:$false] %s1278_s25 }
  0x12   : > { %v489_v16 = vand.u32 (!%p143_p9), %v1225_v14, %v487_v15  ;;  %s1280_s26 = scalar_lea.vmem (!%p143_p9), %s1279_s25, 4096 }
  0x13   : > { %494 = vmatpush1.bf16.msra.mxu0 (!%p143_p9), %v1217_v2  ;;  %1164 = vmatpush1.bf16.msra.mxu1 (!%p143_p9), %v1217_v2 }
  0x14   : > { %495 = vmatprep.subr.bf16.mxu0 (!%p143_p9), %v1338_v1  ;;  %1155 = vmatprep.subr.bf16.mxu1 (!%p143_p9), %v1338_v1 }
  0x15   : > { %s1616_s30 = smov (!%p168_p10, %s925_s30), 63 }
  0x16   : > { %s1024_s6 = sshll.u32 %s1616_s30, 3 }
  0x17   : > { %496 = vmatpush1.bf16.msra.mxu0 %v1218_v3  ;;  %1165 = vmatpush1.bf16.msra.mxu1 %v1218_v3  ;;  %s1427_s9 = scalar_lea.vmem %s1605_s0, %s1024_s6  ;;  %s164_s6 = sand.u32 1, %s1328_s13  }
  0x18   : > { %497 = vmatprep.subr.bf16.mxu0 %v1338_v1  ;;  %1156 = vmatprep.subr.bf16.mxu1 %v1338_v1  ;;  %v1228_v6 = vld [vmem:[%s1427_s9 + $0x4] ss:$8 sps:$4 sm:$0xff]   ;;  %v1226_v17 = vld [vmem:[%s1427_s9] ss:$8 sps:$4 sm:$0xff]   ;;  %v1232_v19 = vld [vmem:[%s1427_s9 + $0x14] ss:$8 sps:$4 sm:$0xff]  }
  0x19   : > { %v1231_v7 = vld [vmem:[%s1427_s9 + $0x84] ss:$8 sps:$4 sm:$0xff]   ;;  %971 = vmatprep.mubr.msk.bf16.mxu0 %vm435_vm0, %v1228_v6  ;;  %v1229_v18 = vld [vmem:[%s1427_s9 + $0x80] ss:$8 sps:$4 sm:$0xff]   ;;  %v1234_v20 = vld [vmem:[%s1427_s9 + $0x94] ss:$8 sps:$4 sm:$0xff]  }
  0x1a   : > { %979 = vmatprep.mubr.msk.bf16.mxu1 %vm435_vm0, %v1231_v7  ;;  %v1236_v21 = vld [vmem:[%s1427_s9 + $0x10] ss:$8 sps:$4 sm:$0xff]   ;;  %v1238_v23 = vld [vmem:[%s1427_s9 + $0x24] ss:$8 sps:$4 sm:$0xff]   ;;  %v1242_v25 = vld [vmem:[%s1427_s9 + $0x20] ss:$8 sps:$4 sm:$0xff]  }
  0x1b   : > { %498 = vmatpush1.bf16.msra.mxu0 %v1219_v4  ;;  %1166 = vmatpush1.bf16.msra.mxu1 %v1219_v4  ;;  %v1237_v22 = vld [vmem:[%s1427_s9 + $0x90] ss:$8 sps:$4 sm:$0xff]   ;;  %v1240_v24 = vld [vmem:[%s1427_s9 + $0xa4] ss:$8 sps:$4 sm:$0xff]   ;;  %v1243_v26 = vld [vmem:[%s1427_s9 + $0xa0] ss:$8 sps:$4 sm:$0xff]  }
  0x1c   : > { %499 = vmatprep.subr.bf16.mxu0 %v1338_v1  ;;  %1157 = vmatprep.subr.bf16.mxu1 %v1338_v1  ;;  %v1244_v27 = vld [vmem:[%s1427_s9 + $0x34] ss:$8 sps:$4 sm:$0xff]   ;;  %v1248_v29 = vld [vmem:[%s1427_s9 + $0x30] ss:$8 sps:$4 sm:$0xff]   ;;  %v1250_v31 = vld [vmem:[%s1427_s9 + $0x44] ss:$8 sps:$4 sm:$0xff]  }
  0x1d   : > { %v1246_v28 = vld [vmem:[%s1427_s9 + $0xb4] ss:$8 sps:$4 sm:$0xff]   ;;  %v1249_v30 = vld [vmem:[%s1427_s9 + $0xb0] ss:$8 sps:$4 sm:$0xff]   ;;  %v1252_v32 = vld [vmem:[%s1427_s9 + $0xc4] ss:$8 sps:$4 sm:$0xff]  }
  0x1e   : > { %v1254_v33 = vld [vmem:[%s1427_s9 + $0x40] ss:$8 sps:$4 sm:$0xff]   ;;  %v1256_v35 = vld [vmem:[%s1427_s9 + $0x54] ss:$8 sps:$4 sm:$0xff]   ;;  %v1260_v37 = vld [vmem:[%s1427_s9 + $0x50] ss:$8 sps:$4 sm:$0xff]  }
  0x1f   : > { %500 = vmatpush1.bf16.msra.mxu0 %v1220_v5  ;;  %1167 = vmatpush1.bf16.msra.mxu1 %v1220_v5  ;;  %v1255_v34 = vld [vmem:[%s1427_s9 + $0xc0] ss:$8 sps:$4 sm:$0xff]   ;;  %v1258_v36 = vld [vmem:[%s1427_s9 + $0xd4] ss:$8 sps:$4 sm:$0xff]   ;;  %v1261_v38 = vld [vmem:[%s1427_s9 + $0xd0] ss:$8 sps:$4 sm:$0xff]  }
  0x20   : > { %501 = vmatprep.subr.bf16.mxu0 %v1338_v1  ;;  %1158 = vmatprep.subr.bf16.mxu1 %v1338_v1  ;;  %v1262_v39 = vld [vmem:[%s1427_s9 + $0x64] ss:$8 sps:$4 sm:$0xff]   ;;  %v1266_v41 = vld [vmem:[%s1427_s9 + $0x60] ss:$8 sps:$4 sm:$0xff]   ;;  %v1268_v43 = vld [vmem:[%s1427_s9 + $0x74] ss:$8 sps:$4 sm:$0xff]  }
  0x21   : > { %v1264_v40 = vld [vmem:[%s1427_s9 + $0xe4] ss:$8 sps:$4 sm:$0xff]   ;;  %v1267_v42 = vld [vmem:[%s1427_s9 + $0xe0] ss:$8 sps:$4 sm:$0xff]   ;;  %v1270_v44 = vld [vmem:[%s1427_s9 + $0xf4] ss:$8 sps:$4 sm:$0xff]  }
  0x22   : > { %v1272_v45 = vld [vmem:[%s1427_s9 + $0x70] ss:$8 sps:$4 sm:$0xff]   ;;  %s924_s7 = sshll.u32 %s164_s6, 7 }
  0x23   : > { %502 = vmatpush1.bf16.msra.mxu0 %v1221_v8  ;;  %1168 = vmatpush1.bf16.msra.mxu1 %v1221_v8  ;;  %v1273_v46 = vld [vmem:[%s1427_s9 + $0xf0] ss:$8 sps:$4 sm:$0xff]   ;;  %s1507_s8 = scalar_lea.vmem [#allocation2], %s924_s7  ;;  %s1057_s9 = sshll.u32 %s1384_s16, 11 }
  0x24   : > { %503 = vmatprep.subr.bf16.mxu0 %v1338_v1  ;;  %1159 = vmatprep.subr.bf16.mxu1 %v1338_v1  ;;  %s858_s10 = sshll.u32 %s1507_s8, 4  ;;  %s1556_s19 = scalar_lea.hbm %s1608_s3, %s1057_s9  ;;  %s1558_s10 = int_to_ptr.vmem [resolvable:$true] %s858_s10 }
  0x25   : > { %s1564_s16 = scalar_lea.sflag [#allocation3], %s164_s6  ;;  %s1274_s20 = scalar_lea.vmem %s1558_s10, 2048 }
  0x26   : > { %p1275_p11 = scmp.ne.s32.totalorder %s1558_s10, %s1274_s20  ;;  %p1281_p0 = scmp.lt.s32.totalorder %s1558_s10, %s1279_s25 }
  0x27   : > { %504 = vmatpush1.bf16.msra.mxu0 %v1222_v9  ;;  %1169 = vmatpush1.bf16.msra.mxu1 %v1222_v9  ;;  %p1282_p1 = scmp.lt.s32.totalorder %s1280_s26, %s1274_s20 }
  0x28   : > { %505 = vmatprep.subr.bf16.mxu0 %v1338_v1  ;;  %1160 = vmatprep.subr.bf16.mxu1 %v1338_v1  ;;  %p1276_p12 = pnand %p1275_p11, %p1401_p5 }
  0x29   : > { %p1283_p2 = por %p1282_p1, %p1281_p0 }
  0x2a   : > { %p1277_p13 = pneg %p1276_p12 }
  0x2b   : > { %506 = vmatpush1.bf16.msra.mxu0 %v1223_v10  ;;  %1170 = vmatpush1.bf16.msra.mxu1 %v1223_v10 }
  0x2c   : > { %507 = vmatprep.subr.bf16.mxu0 %v1338_v1  ;;  %1161 = vmatprep.subr.bf16.mxu1 %v1338_v1  ;;  %p1284_p3 = pnand %p1283_p2, %p1277_p13 }
  0x2f   : > { %508 = vmatpush1.bf16.msra.mxu0 %v1224_v13  ;;  %1171 = vmatpush1.bf16.msra.mxu1 %v1224_v13 }
  0x30   : > { %509 = vmatprep.subr.bf16.mxu0 %v1338_v1  ;;  %1162 = vmatprep.subr.bf16.mxu1 %v1338_v1 }
  0x33   : > { %510 = vmatpush1.bf16.msra.mxu0 %v489_v16  ;;  %1172 = vmatpush1.bf16.msra.mxu1 %v489_v16 }
  0x36   : > { %524 = vmatmul.mubr.bf16.vlgmr.msra.gmra.mrb[0].mxu0 %v1226_v17  ;;  %588 = vmatmul.mubr.bf16.vlgmr.msra.gmra.mrb[0].mxu1 %v1229_v18 }
  0x37   : > { %972 = vmatprep.mubr.msk.bf16.mxu0 %vm435_vm0, %v1232_v19  ;;  %980 = vmatprep.mubr.msk.bf16.mxu1 %vm435_vm0, %v1234_v20 }
  0x3e   : > { %532 = vmatmul.mubr.bf16.gmra.mrb[4].mxu0 %v1236_v21  ;;  %596 = vmatmul.mubr.bf16.gmra.mrb[4].mxu1 %v1237_v22 }
  0x3f   : > { %973 = vmatprep.mubr.msk.bf16.mxu0 %vm435_vm0, %v1238_v23  ;;  %981 = vmatprep.mubr.msk.bf16.mxu1 %vm435_vm0, %v1240_v24 }
  0x46   : > { %540 = vmatmul.mubr.bf16.gmra.mrb[8].mxu0 %v1242_v25  ;;  %604 = vmatmul.mubr.bf16.gmra.mrb[8].mxu1 %v1243_v26 }
  0x47   : > { %974 = vmatprep.mubr.msk.bf16.mxu0 %vm435_vm0, %v1244_v27  ;;  %982 = vmatprep.mubr.msk.bf16.mxu1 %vm435_vm0, %v1246_v28 }
  0x4e   : > { %548 = vmatmul.mubr.bf16.gmra.mrb[12].mxu0 %v1248_v29  ;;  %612 = vmatmul.mubr.bf16.gmra.mrb[12].mxu1 %v1249_v30 }
  0x4f   : > { %975 = vmatprep.mubr.msk.bf16.mxu0 %vm435_vm0, %v1250_v31  ;;  %983 = vmatprep.mubr.msk.bf16.mxu1 %vm435_vm0, %v1252_v32 }
  0x56   : > { %556 = vmatmul.mubr.bf16.gmra.mrb[16].mxu0 %v1254_v33  ;;  %620 = vmatmul.mubr.bf16.gmra.mrb[16].mxu1 %v1255_v34 }
  0x57   : > { %976 = vmatprep.mubr.msk.bf16.mxu0 %vm435_vm0, %v1256_v35  ;;  %984 = vmatprep.mubr.msk.bf16.mxu1 %vm435_vm0, %v1258_v36 }
  0x5e   : > { %564 = vmatmul.mubr.bf16.gmra.mrb[20].mxu0 %v1260_v37  ;;  %628 = vmatmul.mubr.bf16.gmra.mrb[20].mxu1 %v1261_v38 }
  0x5f   : > { %977 = vmatprep.mubr.msk.bf16.mxu0 %vm435_vm0, %v1262_v39  ;;  %985 = vmatprep.mubr.msk.bf16.mxu1 %vm435_vm0, %v1264_v40 }
  0x66   : > { %572 = vmatmul.mubr.bf16.gmra.mrb[24].mxu0 %v1266_v41  ;;  %636 = vmatmul.mubr.bf16.gmra.mrb[24].mxu1 %v1267_v42 }
  0x67   : > { %978 = vmatprep.mubr.msk.bf16.mxu0 %vm435_vm0, %v1268_v43  ;;  %986 = vmatprep.mubr.msk.bf16.mxu1 %vm435_vm0, %v1270_v44 }
  0x6e   : > { %580 = vmatmul.mubr.bf16.gmra.mrb[28].mxu0 %v1272_v45  ;;  %644 = vmatmul.mubr.bf16.gmra.mrb[28].mxu1 %v1273_v46 }
 0x109   : > { %v525_v48 = vpop.f32.mrb[0].mxu0  ;;  %v589_v49 = vpop.f32.mrb[0].mxu1 }
 0x10a   : > { %v526_v50 = vadd.f32 %v1498_v47, %v525_v48  ;;  %v590_v51 = vadd.f32 %v1498_v47, %v589_v49  ;;  %v527_v52 = vpop.f32.mrb[1].mxu0  ;;  %v591_v53 = vpop.f32.mrb[1].mxu1 }
 0x10b   : > { %v528_v54 = vpop.f32.mrb[2].mxu0  ;;  %v592_v55 = vpop.f32.mrb[2].mxu1 }
 0x10c   : > { %v529_v56 = vadd.f32 %v1498_v47, %v528_v54  ;;  %v593_v57 = vadd.f32 %v1498_v47, %v592_v55  ;;  %v530_v58 = vpop.f32.mrb[3].mxu0  ;;  %v594_v59 = vpop.f32.mrb[3].mxu1  ;;  %v652_v60 = vmax.f32 %v526_v50, 0.0  ;;  %v668_v61 = vmax.f32 %v590_v51, 0.0 }
 0x10e   : > { %v653_v62 = vmax.f32 %v529_v56, 0.0  ;;  %v669_v63 = vmax.f32 %v593_v57, 0.0 }
 0x110   : > { %v1061_v0 = vpack.c.bf16 %v653_v62, %v652_v60  ;;  %v1101_v1 = vpack.c.bf16 %v669_v63, %v668_v61 }
 0x111   : > { %v533_v2 = vpop.f32.mrb[4].mxu0  ;;  %v597_v3 = vpop.f32.mrb[4].mxu1 }
 0x112   : > { %1062 = vst [vmem:[%s1507_s8] sm:$0xff] %v1061_v0   ;;  %1145 = vst [vmem:[%s1507_s8 + $0x40] sm:$0xff] %v1101_v1   ;;  %v534_v4 = vadd.f32 %v1498_v47, %v533_v2  ;;  %v598_v5 = vadd.f32 %v1498_v47, %v597_v3  ;;  %v535_v6 = vpop.f32.mrb[5].mxu0  ;;  %v599_v7 = vpop.f32.mrb[5].mxu1 }
 0x113   : > { %v536_v8 = vpop.f32.mrb[6].mxu0  ;;  %v600_v9 = vpop.f32.mrb[6].mxu1 }
 0x114   : > { %v537_v10 = vadd.f32 %v1498_v47, %v536_v8  ;;  %v601_v11 = vadd.f32 %v1498_v47, %v600_v9  ;;  %v538_v12 = vpop.f32.mrb[7].mxu0  ;;  %v602_v13 = vpop.f32.mrb[7].mxu1  ;;  %v654_v14 = vmax.f32 %v534_v4, 0.0  ;;  %v670_v15 = vmax.f32 %v598_v5, 0.0 }
 0x116   : > { %v655_v16 = vmax.f32 %v537_v10, 0.0  ;;  %v671_v17 = vmax.f32 %v601_v11, 0.0 }
 0x118   : > { %v1066_v18 = vpack.c.bf16 %v655_v16, %v654_v14  ;;  %v1106_v19 = vpack.c.bf16 %v671_v17, %v670_v15 }
 0x119   : > { %v541_v20 = vpop.f32.mrb[8].mxu0  ;;  %v605_v21 = vpop.f32.mrb[8].mxu1 }
 0x11a   : > { %1138 = vst [vmem:[%s1507_s8 + $0x8] sm:$0xff] %v1066_v18   ;;  %1146 = vst [vmem:[%s1507_s8 + $0x48] sm:$0xff] %v1106_v19   ;;  %v542_v22 = vadd.f32 %v1498_v47, %v541_v20  ;;  %v606_v23 = vadd.f32 %v1498_v47, %v605_v21  ;;  %v543_v24 = vpop.f32.mrb[9].mxu0  ;;  %v607_v25 = vpop.f32.mrb[9].mxu1 }
 0x11b   : > { %v544_v26 = vpop.f32.mrb[10].mxu0  ;;  %v608_v27 = vpop.f32.mrb[10].mxu1 }
 0x11c   : > { %v545_v28 = vadd.f32 %v1498_v47, %v544_v26  ;;  %v609_v29 = vadd.f32 %v1498_v47, %v608_v27  ;;  %v546_v30 = vpop.f32.mrb[11].mxu0  ;;  %v610_v31 = vpop.f32.mrb[11].mxu1  ;;  %v656_v32 = vmax.f32 %v542_v22, 0.0  ;;  %v672_v33 = vmax.f32 %v606_v23, 0.0 }
 0x11e   : > { %v657_v34 = vmax.f32 %v545_v28, 0.0  ;;  %v673_v35 = vmax.f32 %v609_v29, 0.0 }
 0x120   : > { %v1071_v36 = vpack.c.bf16 %v657_v34, %v656_v32  ;;  %v1111_v37 = vpack.c.bf16 %v673_v35, %v672_v33 }
 0x121   : > { %v549_v38 = vpop.f32.mrb[12].mxu0  ;;  %v613_v39 = vpop.f32.mrb[12].mxu1 }
 0x122   : > { %1139 = vst [vmem:[%s1507_s8 + $0x10] sm:$0xff] %v1071_v36   ;;  %1147 = vst [vmem:[%s1507_s8 + $0x50] sm:$0xff] %v1111_v37   ;;  %v550_v40 = vadd.f32 %v1498_v47, %v549_v38  ;;  %v614_v41 = vadd.f32 %v1498_v47, %v613_v39  ;;  %v551_v42 = vpop.f32.mrb[13].mxu0  ;;  %v615_v43 = vpop.f32.mrb[13].mxu1 }
 0x123   : > { %v552_v44 = vpop.f32.mrb[14].mxu0  ;;  %v616_v45 = vpop.f32.mrb[14].mxu1 }
 0x124   : > { %v553_v46 = vadd.f32 %v1498_v47, %v552_v44  ;;  %v617_v48 = vadd.f32 %v1498_v47, %v616_v45  ;;  %v554_v49 = vpop.f32.mrb[15].mxu0  ;;  %v618_v50 = vpop.f32.mrb[15].mxu1  ;;  %v658_v51 = vmax.f32 %v550_v40, 0.0  ;;  %v674_v52 = vmax.f32 %v614_v41, 0.0 }
 0x126   : > { %v659_v53 = vmax.f32 %v553_v46, 0.0  ;;  %v675_v54 = vmax.f32 %v617_v48, 0.0 }
 0x128   : > { %v1076_v55 = vpack.c.bf16 %v659_v53, %v658_v51  ;;  %v1116_v56 = vpack.c.bf16 %v675_v54, %v674_v52 }
 0x129   : > { %v557_v57 = vpop.f32.mrb[16].mxu0  ;;  %v621_v58 = vpop.f32.mrb[16].mxu1 }
 0x12a   : > { %1140 = vst [vmem:[%s1507_s8 + $0x18] sm:$0xff] %v1076_v55   ;;  %1148 = vst [vmem:[%s1507_s8 + $0x58] sm:$0xff] %v1116_v56   ;;  %v558_v59 = vadd.f32 %v1498_v47, %v557_v57  ;;  %v622_v60 = vadd.f32 %v1498_v47, %v621_v58  ;;  %v559_v61 = vpop.f32.mrb[17].mxu0  ;;  %v623_v62 = vpop.f32.mrb[17].mxu1 }
 0x12b   : > { %v560_v63 = vpop.f32.mrb[18].mxu0  ;;  %v624_v0 = vpop.f32.mrb[18].mxu1 }
 0x12c   : > { %v561_v1 = vadd.f32 %v1498_v47, %v560_v63  ;;  %v625_v2 = vadd.f32 %v1498_v47, %v624_v0  ;;  %v562_v3 = vpop.f32.mrb[19].mxu0  ;;  %v626_v4 = vpop.f32.mrb[19].mxu1  ;;  %v660_v5 = vmax.f32 %v558_v59, 0.0  ;;  %v676_v6 = vmax.f32 %v622_v60, 0.0 }
 0x12e   : > { %v661_v7 = vmax.f32 %v561_v1, 0.0  ;;  %v677_v8 = vmax.f32 %v625_v2, 0.0 }
 0x130   : > { %v1081_v9 = vpack.c.bf16 %v661_v7, %v660_v5  ;;  %v1121_v10 = vpack.c.bf16 %v677_v8, %v676_v6 }
 0x131   : > { %v565_v11 = vpop.f32.mrb[20].mxu0  ;;  %v629_v12 = vpop.f32.mrb[20].mxu1 }
 0x132   : > { %1141 = vst [vmem:[%s1507_s8 + $0x20] sm:$0xff] %v1081_v9   ;;  %1149 = vst [vmem:[%s1507_s8 + $0x60] sm:$0xff] %v1121_v10   ;;  %v566_v13 = vadd.f32 %v1498_v47, %v565_v11  ;;  %v630_v14 = vadd.f32 %v1498_v47, %v629_v12  ;;  %v567_v15 = vpop.f32.mrb[21].mxu0  ;;  %v631_v16 = vpop.f32.mrb[21].mxu1 }
 0x133   : > { %v568_v17 = vpop.f32.mrb[22].mxu0  ;;  %v632_v18 = vpop.f32.mrb[22].mxu1 }
 0x134   : > { %v569_v19 = vadd.f32 %v1498_v47, %v568_v17  ;;  %v633_v20 = vadd.f32 %v1498_v47, %v632_v18  ;;  %v570_v21 = vpop.f32.mrb[23].mxu0  ;;  %v634_v22 = vpop.f32.mrb[23].mxu1  ;;  %v662_v23 = vmax.f32 %v566_v13, 0.0  ;;  %v678_v24 = vmax.f32 %v630_v14, 0.0 }
 0x136   : > { %v663_v25 = vmax.f32 %v569_v19, 0.0  ;;  %v679_v26 = vmax.f32 %v633_v20, 0.0 }
 0x138   : > { %v1086_v27 = vpack.c.bf16 %v663_v25, %v662_v23  ;;  %v1126_v28 = vpack.c.bf16 %v679_v26, %v678_v24 }
 0x139   : > { %v573_v29 = vpop.f32.mrb[24].mxu0  ;;  %v637_v30 = vpop.f32.mrb[24].mxu1 }
 0x13a   : > { %1142 = vst [vmem:[%s1507_s8 + $0x28] sm:$0xff] %v1086_v27   ;;  %1150 = vst [vmem:[%s1507_s8 + $0x68] sm:$0xff] %v1126_v28   ;;  %v574_v31 = vadd.f32 %v1498_v47, %v573_v29  ;;  %v638_v32 = vadd.f32 %v1498_v47, %v637_v30  ;;  %v575_v33 = vpop.f32.mrb[25].mxu0  ;;  %v639_v34 = vpop.f32.mrb[25].mxu1 }
 0x13b   : > { %v576_v35 = vpop.f32.mrb[26].mxu0  ;;  %v640_v36 = vpop.f32.mrb[26].mxu1 }
 0x13c   : > { %v577_v37 = vadd.f32 %v1498_v47, %v576_v35  ;;  %v641_v38 = vadd.f32 %v1498_v47, %v640_v36  ;;  %v578_v39 = vpop.f32.mrb[27].mxu0  ;;  %v642_v40 = vpop.f32.mrb[27].mxu1  ;;  %v664_v41 = vmax.f32 %v574_v31, 0.0  ;;  %v680_v42 = vmax.f32 %v638_v32, 0.0 }
 0x13e   : > { %v665_v43 = vmax.f32 %v577_v37, 0.0  ;;  %v681_v44 = vmax.f32 %v641_v38, 0.0 }
 0x140   : > { %v1091_v45 = vpack.c.bf16 %v665_v43, %v664_v41  ;;  %v1131_v46 = vpack.c.bf16 %v681_v44, %v680_v42 }
 0x141   : > { %v581_v48 = vpop.f32.mrb[28].mxu0  ;;  %v645_v49 = vpop.f32.mrb[28].mxu1 }
 0x142   : > { %1143 = vst [vmem:[%s1507_s8 + $0x30] sm:$0xff] %v1091_v45   ;;  %1151 = vst [vmem:[%s1507_s8 + $0x70] sm:$0xff] %v1131_v46   ;;  %v582_v50 = vadd.f32 %v1498_v47, %v581_v48  ;;  %v646_v51 = vadd.f32 %v1498_v47, %v645_v49  ;;  %v583_v52 = vpop.f32.mrb[29].mxu0  ;;  %v647_v53 = vpop.f32.mrb[29].mxu1 }
 0x143   : > { %v584_v54 = vpop.f32.mrb[30].mxu0  ;;  %v648_v55 = vpop.f32.mrb[30].mxu1 }
 0x144   : > { %v585_v56 = vadd.f32 %v1498_v47, %v584_v54  ;;  %v649_v57 = vadd.f32 %v1498_v47, %v648_v55  ;;  %v586_v58 = vpop.f32.mrb[31].mxu0  ;;  %v650_v59 = vpop.f32.mrb[31].mxu1  ;;  %v666_v60 = vmax.f32 %v582_v50, 0.0  ;;  %v682_v61 = vmax.f32 %v646_v51, 0.0 }
 0x146   : > { %v667_v62 = vmax.f32 %v585_v56, 0.0  ;;  %v683_v63 = vmax.f32 %v649_v57, 0.0 }
 0x148   : > { %v1096_v47 = vpack.c.bf16 %v667_v62, %v666_v60  ;;  %v1136_v0 = vpack.c.bf16 %v683_v63, %v682_v61 }
 0x14a   : > { %1144 = vst [vmem:[%s1507_s8 + $0x38] sm:$0xff] %v1096_v47   ;;  %1152 = vst [vmem:[%s1507_s8 + $0x78] sm:$0xff] %v1136_v0  }
 0x14b   : > { %1287 = shalt.err (!%p1284_p3)
}
 0x14c   : > { %s1288_s27 = scalar_lea.hbm %s1556_s19, 2048  ;;  %s1292_s30 = scalar_lea.hbm %s1608_s3, 4096 }
 0x14d   : > { %p1289_p4 = scmp.ne.s32.totalorder %s1556_s19, %s1288_s27  ;;  %p1293_p9 = scmp.lt.u32.totalorder %s1556_s19, %s1608_s3 }
 0x14e   : > { %p1294_p10 = scmp.lt.u32.totalorder %s1292_s30, %s1288_s27  ;;  %p1296_p12 = scmp.lt.u32.totalorder %s1288_s27, %s1556_s19 }
 0x14f   : > { %p1290_p7 = pnand %p1289_p4, %p1401_p5 }
 0x150   : > { %p1295_p11 = por %p1294_p10, %p1293_p9 }
 0x151   : > { %p1291_p8 = pneg %p1290_p7 }
 0x152   : > { %p1297_p13 = por %p1296_p12, %p1295_p11 }
 0x154   : > { %p1298_p0 = pnand %p1297_p13, %p1291_p8 }
 0x156   : > { %1301 = shalt.err (!%p1298_p0)
}
 0x157   : > { %s1341_s6 = smov 64   ;;  %s1342_s7 = smov 4  }
 0x158   : > { %1173 = dma.vmem_to_hbm [thread:$0]  (%p1401_p5), %s1558_s10, 2048, %s1556_s19, %s1564_s16, %s1341_s6, %s1341_s6, %s1342_s7  }
 0x159 PF: > { %p1179_p1 = scmp.ge.s32.totalorder %s1336_s15, 2  ;;  %s873_s8 = sand.u32 1, %s1324_s12  }
 0x15a   : > { %s874_s9 = scalar_lea.sflag [#allocation3], %s873_s8 }
 0x15b   : > { %p1176_p2 = pnand %p1179_p1, %p1405_p6 }
 0x15d   : > { %1319 = dma.done.wait (!%p1176_p2), %s874_s9, 2048  }
 0x15e   : > { %1321 = vsyncadd (!%p1176_p2), %s874_s9, 4294965248  ;;  %p13_p3 = scmp.ge.s32.totalorder %s1388_s18, 4   ;;  %s1611_s12 = smov %s1328_s13 }
 0x15f   : > { %s1612_s13 = smov %s1332_s14  ;;  %s1613_s14 = smov %s1399_s21 }
 0x160   : > { %s1614_s15 = smov %s1388_s18  ;;  %15 = sbr.rel (!%p13_p3) target bundleno = 3 (0x3), region = 67 }
 0x167   :  { %879 = vsyncpa [#allocation3], 1 }
 0x168   :  { %881 = vsyncpa [#allocation3 + $0x1], 1 }

</bundles_post_ra>
